<compile_context>
chip_gen: v7x
topology: tpu7x:2x2x1
jax: 0.10.0
libtpu: 0.0.40
codegen_flags: <defaults>
</compile_context>

<pallas_src>
import math

import jax
import jax.numpy as jnp
from jax import lax
from jax.experimental import pallas as pl
from jax.experimental.pallas import tpu as pltpu


# ------------------------------ VMEM sizing ----------------------------------
def _vmem_capacity_bytes():
    try:
        info = pltpu.get_tpu_info()
        cap = getattr(info, "vmem_capacity_bytes", None)
        if cap:
            return int(cap)
    except Exception:
        pass
    return 64 << 20  # conservative default (v7x per-TC VMEM)


def _default_block_rows(N, E, F, o_pad, vmem_cap):
    """Node-row tile: as large as fits ~60% of VMEM, balanced across tiles."""
    budget = (vmem_cap * 3) // 5
    # double-buffered streamed bytes per node row: H(bf16) + x(f32) + out(f32)
    per_row = 2 * (E * 2 + F * 4 + o_pad * 4)
    # resident operands: m, W, hw/scale rows, bias row (f32)
    resident = 4 * (E * o_pad + F * o_pad + 4 * E + 2 * o_pad)
    tm_cap = (budget - resident) // max(per_row, 1)
    tm_cap = max(16, min(512, (tm_cap // 16) * 16))
    n_tiles = max(1, math.ceil(N / tm_cap))
    tm = ((math.ceil(N / n_tiles) + 15) // 16) * 16
    return max(16, min(tm, tm_cap))


# --------------------------------- Wrapper ------------------------------------
def hgnn_conv(x, hypergraph, weight, V, bias, *, block_rows=None):
    """out = D_v H diag(hw) diag(deg_e) H^T D_v (x W) + b ;  hw = sigmoid(H^T x V)."""
    N, F = x.shape
    _, E = hypergraph.shape
    O = weight.shape[1]
    f32 = jnp.float32

    # Lane-dense output feature dim; slice back to O afterwards.
    o_pad = ((O + 127) // 128) * 128

    vmem_cap = _vmem_capacity_bytes()
    if block_rows is None:
        tm = _default_block_rows(N, E, F, o_pad, vmem_cap)
    else:
        tm = max(16, ((int(block_rows) + 15) // 16) * 16)
    nt = pl.cdiv(N, tm)

    per_row = 2 * (E * 2 + F * 4 + o_pad * 4)
    resident = 4 * (E * o_pad + F * o_pad + 4 * E + 2 * o_pad)
    vmem_limit = int(min(int(0.9 * vmem_cap),
                         max(32 << 20, resident + tm * per_row + (4 << 20))))
    cp_arb = pltpu.CompilerParams(dimension_semantics=("arbitrary",),
                                  vmem_limit_bytes=vmem_limit)
    cp_par = pltpu.CompilerParams(dimension_semantics=("parallel",),
                                  vmem_limit_bytes=vmem_limit)

    # Small parameter tensors in padded / lane-dense layouts (one-time cost).
    w_p = jnp.pad(weight, ((0, 0), (0, o_pad - O))) if o_pad != O else weight
    b_p = jnp.pad(bias, (0, o_pad - O)) if o_pad != O else bias
    w_p = w_p.astype(f32)
    b_row = b_p.reshape(1, o_pad).astype(f32)
    vt = V.reshape(1, F).astype(f32)

    # H is 0/1 -> exact in bf16; halves the HBM stream it is read 3x from.
    # (In a real model H is static across layers, so this cast amortizes.)
    h_b = hypergraph.astype(jnp.bfloat16)
    x = x.astype(f32)

    # -------------------- Kernel 1: edge pass (logits / deg_e) --------------------
    def edge_pass_kernel(x_ref, h_ref, vt_ref, hw_ref, de_ref):
        k = pl.program_id(0)

        @pl.when(k == 0)
        def _init():
            hw_ref[...] = jnp.zeros_like(hw_ref)
            de_ref[...] = jnp.zeros_like(de_ref)

        rows = lax.broadcasted_iota(jnp.int32, (tm, 1), 0) + k * tm
        valid = rows < N                                            # tail mask
        h = jnp.where(valid, h_ref[...].astype(jnp.float32), 0.0)   # [tm, E]
        xv = jnp.sum(x_ref[...] * vt_ref[...], axis=-1, keepdims=True)  # x @ V
        xv = jnp.where(valid, xv, 0.0)                              # [tm, 1]
        # logits += H_tile^T (x_tile V), produced as a lane-dense [1, E] row.
        hw_ref[...] += jnp.sum(xv * h, axis=0, keepdims=True)
        de_ref[...] += jnp.sum(h, axis=0, keepdims=True)            # degree_e

        @pl.when(k == pl.num_programs(0) - 1)
        def _fin():
            hw = jax.nn.sigmoid(hw_ref[...])
            hw_ref[...] = hw
            de_ref[...] = hw * de_ref[...]                          # hw * deg_e

    # --------------- Kernel 2: m = diag(hw*deg_e) H^T (deg_v * (x W)) -------------
    def gather_pass_kernel(x_ref, h_ref, w_ref, hw_ref, scale_ref, m_ref):
        k = pl.program_id(0)

        @pl.when(k == 0)
        def _init():
            m_ref[...] = jnp.zeros_like(m_ref)

        rows = lax.broadcasted_iota(jnp.int32, (tm, 1), 0) + k * tm
        valid = rows < N
        h = jnp.where(valid, h_ref[...].astype(jnp.float32), 0.0)   # [tm, E]
        deg_v = jnp.sum(h * hw_ref[...], axis=-1, keepdims=True)    # [tm, 1]
        xw = jnp.dot(x_ref[...], w_ref[...],
                     preferred_element_type=jnp.float32)            # [tm, o_pad]
        t = jnp.where(valid, deg_v * xw, 0.0)
        # H_tile^T @ t, contracting the node axis (no transposed copy of H).
        m_ref[...] += lax.dot_general(
            h, t, (((0,), (0,)), ((), ())),
            preferred_element_type=jnp.float32)

        @pl.when(k == pl.num_programs(0) - 1)
        def _fin():
            # Fold the per-edge hw*deg_e scale into m once (not per node tile).
            m_ref[...] = m_ref[...] * scale_ref[...]

    # --------------------- Kernel 3: out = deg_v * (H @ m) + b --------------------
    def node_pass_kernel(h_ref, hw_ref, m_ref, b_ref, out_ref):
        h = h_ref[...].astype(jnp.float32)                          # [tm, E]
        deg_v = jnp.sum(h * hw_ref[...], axis=-1, keepdims=True)    # [tm, 1]
        t = jnp.dot(h, m_ref[...], preferred_element_type=jnp.float32)
        out_ref[...] = (deg_v * t + b_ref[...]).astype(out_ref.dtype)

    # ---- Pass 1 ----
    hw_row, scale_row = pl.pallas_call(
        edge_pass_kernel,
        out_shape=(jax.ShapeDtypeStruct((1, E), f32),
                   jax.ShapeDtypeStruct((1, E), f32)),
        grid_spec=pltpu.PrefetchScalarGridSpec(
            num_scalar_prefetch=0,
            grid=(nt,),
            in_specs=[
                pl.BlockSpec((tm, F), lambda k: (k, 0)),
                pl.BlockSpec((tm, E), lambda k: (k, 0)),
                pl.BlockSpec((1, F), lambda k: (0, 0)),
            ],
            out_specs=(pl.BlockSpec((1, E), lambda k: (0, 0)),
                       pl.BlockSpec((1, E), lambda k: (0, 0))),
        ),
        compiler_params=cp_arb,
    )(x, h_b, vt)

    scale_col = scale_row.reshape(E, 1)   # tiny row -> column for m scaling

    # ---- Pass 2 ----
    m_scaled = pl.pallas_call(
        gather_pass_kernel,
        out_shape=jax.ShapeDtypeStruct((E, o_pad), f32),
        grid_spec=pltpu.PrefetchScalarGridSpec(
            num_scalar_prefetch=0,
            grid=(nt,),
            in_specs=[
                pl.BlockSpec((tm, F), lambda k: (k, 0)),
                pl.BlockSpec((tm, E), lambda k: (k, 0)),
                pl.BlockSpec((F, o_pad), lambda k: (0, 0)),
                pl.BlockSpec((1, E), lambda k: (0, 0)),
                pl.BlockSpec((E, 1), lambda k: (0, 0)),
            ],
            out_specs=pl.BlockSpec((E, o_pad), lambda k: (0, 0)),
        ),
        compiler_params=cp_arb,
    )(x, h_b, w_p, hw_row, scale_col)

    # ---- Pass 3 ----
    out_p = pl.pallas_call(
        node_pass_kernel,
        out_shape=jax.ShapeDtypeStruct((N, o_pad), f32),
        grid_spec=pltpu.PrefetchScalarGridSpec(
            num_scalar_prefetch=0,
            grid=(nt,),
            in_specs=[
                pl.BlockSpec((tm, E), lambda k: (k, 0)),
                pl.BlockSpec((1, E), lambda k: (0, 0)),
                pl.BlockSpec((E, o_pad), lambda k: (0, 0)),
                pl.BlockSpec((1, o_pad), lambda k: (0, 0)),
            ],
            out_specs=pl.BlockSpec((tm, o_pad), lambda k: (k, 0)),
        ),
        compiler_params=cp_par,
    )(h_b, hw_row, m_scaled, b_row)

    return out_p[:, :O], hw_row[0, :]


# ------------------------------- Reference ------------------------------------
def hgnn_conv_ref(x, hypergraph, weight, V, bias):
    """Pure-JAX reference mirroring the PyTorch forward exactly."""
    ht = hypergraph.T
    edge_emb = ht @ x
    hw = jax.nn.sigmoid(edge_emb @ V)                     # [E, 1]
    degree_v = jnp.sum(hypergraph @ hw, axis=-1)          # [N]
    degree_e = jnp.sum(hypergraph, axis=0)                # [E]
    inv_degree_e = jnp.diag(degree_e)                     # (not inverted, as in torch code)
    d_v2 = jnp.diag(degree_v)
    w_diag = jnp.diag(hw.squeeze())
    adj = d_v2 @ hypergraph @ w_diag @ inv_degree_e @ ht @ d_v2
    out = x @ weight
    out = adj @ out + bias
    return out, hw.squeeze()


def kaiming_uniform(key, shape):
    # PyTorch kaiming_uniform_ default: bound = sqrt(6 / fan_in), fan_in = shape[1].
    fan_in = shape[1]
    bound = math.sqrt(6.0 / fan_in)
    return jax.random.uniform(key, shape, jnp.float32, minval=-bound, maxval=bound)


if __name__ == "__main__":
    N, E = 64, 32          # nodes, hyperedges
    in_ft, out_ft = 16, 8

    key = jax.random.PRNGKey(0)
    k_x, k_h, k_w, k_v = jax.random.split(key, 4)

    x = jax.random.normal(k_x, (N, in_ft), dtype=jnp.float32)
    hypergraph = jax.random.bernoulli(k_h, 0.3, (N, E)).astype(jnp.float32)

    weight = kaiming_uniform(k_w, (in_ft, out_ft))
    V = kaiming_uniform(k_v, (in_ft, 1))
    bias = jnp.zeros((out_ft,), dtype=jnp.float32)

    out_ref, hw_ref = hgnn_conv_ref(x, hypergraph, weight, V, bias)

    # block_rows=48 -> 2 node tiles with a ragged, in-kernel-masked tail tile;
    # block_rows=None -> auto (VMEM-budgeted) tile size.
    for br in (48, None):
        out, hw = hgnn_conv(x, hypergraph, weight, V, bias, block_rows=br)
        jax.block_until_ready((out, hw))
        assert out.shape == (N, out_ft) and hw.shape == (E,)
        rel_out = jnp.max(jnp.abs(out - out_ref)) / (jnp.max(jnp.abs(out_ref)) + 1e-6)
        rel_hw = jnp.max(jnp.abs(hw - hw_ref)) / (jnp.max(jnp.abs(hw_ref)) + 1e-6)
        assert float(rel_out) < 1e-2, f"out mismatch (block_rows={br}): rel {float(rel_out)}"
        assert float(rel_hw) < 1e-2, f"hw mismatch (block_rows={br}): rel {float(rel_hw)}"

    print("KERNEL_OK")
</pallas_src>

<mosaic_0001>
module attributes {stable_mosaic.version = 11 : i64} {
  func.func @edge_pass_kernel(%arg0: i32, %arg1: memref<48x16xf32, #tpu.memory_space<vmem>>, %arg2: memref<48x32xbf16, #tpu.memory_space<vmem>>, %arg3: memref<1x16xf32, #tpu.memory_space<vmem>>, %arg4: memref<1x32xf32, #tpu.memory_space<vmem>>, %arg5: memref<1x32xf32, #tpu.memory_space<vmem>>) attributes {dimension_semantics = [#tpu.dimension_semantics<arbitrary>], iteration_bounds = array<i64: 2>, scalar_prefetch = 0 : i64, scratch_operands = 0 : i64, tpu.core_type = #tpu.core_type<tc>, window_params = [{transform_indices = @transform_0, window_bounds = array<i64: 48, 16>}, {transform_indices = @transform_1, window_bounds = array<i64: 48, 32>}, {pipeline_mode = #tpu.pipeline_mode<synchronous>, transform_indices = @transform_2, window_bounds = array<i64: 1, 16>}, {pipeline_mode = #tpu.pipeline_mode<synchronous>, transform_indices = @transform_3, window_bounds = array<i64: 1, 32>}, {pipeline_mode = #tpu.pipeline_mode<synchronous>, transform_indices = @transform_4, window_bounds = array<i64: 1, 32>}]} {
    %c0_i32 = arith.constant 0 : i32
    %0 = arith.cmpi eq, %arg0, %c0_i32 : i32
    %1 = arith.extui %0 : i1 to i32
    %c0_i32_0 = arith.constant 0 : i32
    %2 = arith.cmpi ne, %1, %c0_i32_0 : i32
    scf.if %2 {
      %cst_19 = arith.constant 0.000000e+00 : f32
      %38 = vector.broadcast %cst_19 : f32 to vector<1x32xf32>
      %c0_20 = arith.constant 0 : index
      %c0_21 = arith.constant 0 : index
      %39 = vector.load %arg4[%c0_20, %c0_21] : memref<1x32xf32, #tpu.memory_space<vmem>>, vector<1x32xf32>
      tpu.vector_store %arg4[%c0_20, %c0_21], %38 {strides = array<i32>} : memref<1x32xf32, #tpu.memory_space<vmem>>, vector<1x32xf32>,
      %cst_22 = arith.constant 0.000000e+00 : f32
      %40 = vector.broadcast %cst_22 : f32 to vector<1x32xf32>
      %c0_23 = arith.constant 0 : index
      %c0_24 = arith.constant 0 : index
      %41 = vector.load %arg5[%c0_23, %c0_24] : memref<1x32xf32, #tpu.memory_space<vmem>>, vector<1x32xf32>
      tpu.vector_store %arg5[%c0_23, %c0_24], %40 {strides = array<i32>} : memref<1x32xf32, #tpu.memory_space<vmem>>, vector<1x32xf32>,
    } else {
    }
    %3 = tpu.iota {dimensions = array<i32: 0>} : vector<48x1xi32>
    %c48_i32 = arith.constant 48 : i32
    %4 = arith.muli %arg0, %c48_i32 : i32
    %5 = vector.broadcast %4 : i32 to vector<48x1xi32>
    %6 = arith.addi %3, %5 : vector<48x1xi32>
    %c64_i32 = arith.constant 64 : i32
    %7 = vector.broadcast %c64_i32 : i32 to vector<48x1xi32>
    %8 = arith.cmpi slt, %6, %7 : vector<48x1xi32>
    %c0 = arith.constant 0 : index
    %c0_1 = arith.constant 0 : index
    %9 = vector.load %arg2[%c0, %c0_1] : memref<48x32xbf16, #tpu.memory_space<vmem>>, vector<48x32xbf16>
    %10 = arith.extf %9 : vector<48x32xbf16> to vector<48x32xf32>
    %cst = arith.constant 0.000000e+00 : f32
    %11 = vector.shape_cast %8 : vector<48x1xi1> to vector<48x1xi1>
    %12 = vector.broadcast %11 : vector<48x1xi1> to vector<48x32xi1>
    %13 = vector.broadcast %cst : f32 to vector<48x32xf32>
    %14 = arith.select %12, %10, %13 : vector<48x32xi1>, vector<48x32xf32>
    %c0_2 = arith.constant 0 : index
    %c0_3 = arith.constant 0 : index
    %15 = vector.load %arg1[%c0_2, %c0_3] : memref<48x16xf32, #tpu.memory_space<vmem>>, vector<48x16xf32>
    %c0_4 = arith.constant 0 : index
    %c0_5 = arith.constant 0 : index
    %16 = vector.load %arg3[%c0_4, %c0_5] : memref<1x16xf32, #tpu.memory_space<vmem>>, vector<1x16xf32>
    %17 = vector.broadcast %16 : vector<1x16xf32> to vector<48x16xf32>
    %18 = arith.mulf %15, %17 : vector<48x16xf32>
    %cst_6 = arith.constant dense<0.000000e+00> : vector<48xf32>
    %19 = vector.multi_reduction <add>, %18, %cst_6 [1] : vector<48x16xf32> to vector<48xf32>
    %20 = vector.shape_cast %19 : vector<48xf32> to vector<48x1xf32>
    %cst_7 = arith.constant 0.000000e+00 : f32
    %21 = vector.broadcast %cst_7 : f32 to vector<48x1xf32>
    %22 = arith.select %8, %20, %21 : vector<48x1xi1>, vector<48x1xf32>
    %c0_8 = arith.constant 0 : index
    %c0_9 = arith.constant 0 : index
    %23 = vector.load %arg4[%c0_8, %c0_9] : memref<1x32xf32, #tpu.memory_space<vmem>>, vector<1x32xf32>
    %24 = vector.broadcast %22 : vector<48x1xf32> to vector<48x32xf32>
    %25 = arith.mulf %24, %14 : vector<48x32xf32>
    %cst_10 = arith.constant dense<0.000000e+00> : vector<32xf32>
    %26 = vector.multi_reduction <add>, %25, %cst_10 [0] : vector<48x32xf32> to vector<32xf32>
    %27 = vector.shape_cast %26 : vector<32xf32> to vector<1x32xf32>
    %28 = arith.addf %23, %27 : vector<1x32xf32>
    %c0_11 = arith.constant 0 : index
    %c0_12 = arith.constant 0 : index
    %29 = vector.load %arg4[%c0_11, %c0_12] : memref<1x32xf32, #tpu.memory_space<vmem>>, vector<1x32xf32>
    tpu.vector_store %arg4[%c0_11, %c0_12], %28 {strides = array<i32>} : memref<1x32xf32, #tpu.memory_space<vmem>>, vector<1x32xf32>,
    %c0_13 = arith.constant 0 : index
    %c0_14 = arith.constant 0 : index
    %30 = vector.load %arg5[%c0_13, %c0_14] : memref<1x32xf32, #tpu.memory_space<vmem>>, vector<1x32xf32>
    %cst_15 = arith.constant dense<0.000000e+00> : vector<32xf32>
    %31 = vector.multi_reduction <add>, %14, %cst_15 [0] : vector<48x32xf32> to vector<32xf32>
    %32 = vector.shape_cast %31 : vector<32xf32> to vector<1x32xf32>
    %33 = arith.addf %30, %32 : vector<1x32xf32>
    %c0_16 = arith.constant 0 : index
    %c0_17 = arith.constant 0 : index
    %34 = vector.load %arg5[%c0_16, %c0_17] : memref<1x32xf32, #tpu.memory_space<vmem>>, vector<1x32xf32>
    tpu.vector_store %arg5[%c0_16, %c0_17], %33 {strides = array<i32>} : memref<1x32xf32, #tpu.memory_space<vmem>>, vector<1x32xf32>,
    %c1_i32 = arith.constant 1 : i32
    %35 = arith.cmpi eq, %arg0, %c1_i32 : i32
    %36 = arith.extui %35 : i1 to i32
    %c0_i32_18 = arith.constant 0 : i32
    %37 = arith.cmpi ne, %36, %c0_i32_18 : i32
    scf.if %37 {
      %c0_19 = arith.constant 0 : index
      %c0_20 = arith.constant 0 : index
      %38 = vector.load %arg4[%c0_19, %c0_20] : memref<1x32xf32, #tpu.memory_space<vmem>>, vector<1x32xf32>
      %39 = arith.negf %38 : vector<1x32xf32>
      %40 = math.exp %39 : vector<1x32xf32>
      %cst_21 = arith.constant 1.000000e+00 : f32
      %41 = vector.broadcast %cst_21 : f32 to vector<1x32xf32>
      %42 = arith.addf %41, %40 : vector<1x32xf32>
      %43 = arith.divf %41, %42 : vector<1x32xf32>
      %c0_22 = arith.constant 0 : index
      %c0_23 = arith.constant 0 : index
      %44 = vector.load %arg4[%c0_22, %c0_23] : memref<1x32xf32, #tpu.memory_space<vmem>>, vector<1x32xf32>
      tpu.vector_store %arg4[%c0_22, %c0_23], %43 {strides = array<i32>} : memref<1x32xf32, #tpu.memory_space<vmem>>, vector<1x32xf32>,
      %c0_24 = arith.constant 0 : index
      %c0_25 = arith.constant 0 : index
      %45 = vector.load %arg5[%c0_24, %c0_25] : memref<1x32xf32, #tpu.memory_space<vmem>>, vector<1x32xf32>
      %46 = arith.mulf %43, %45 : vector<1x32xf32>
      %c0_26 = arith.constant 0 : index
      %c0_27 = arith.constant 0 : index
      %47 = vector.load %arg5[%c0_26, %c0_27] : memref<1x32xf32, #tpu.memory_space<vmem>>, vector<1x32xf32>
      tpu.vector_store %arg5[%c0_26, %c0_27], %46 {strides = array<i32>} : memref<1x32xf32, #tpu.memory_space<vmem>>, vector<1x32xf32>,
    } else {
    }
    return
  }
  func.func @transform_0(%arg0: i32) -> (i32, i32) {
    %c0_i32 = arith.constant 0 : i32
    %c0_i32_0 = arith.constant 0 : i32
    return %arg0, %c0_i32 : i32, i32
  }
  func.func @transform_1(%arg0: i32) -> (i32, i32) {
    %c0_i32 = arith.constant 0 : i32
    %c0_i32_0 = arith.constant 0 : i32
    return %arg0, %c0_i32 : i32, i32
  }
  func.func @transform_2(%arg0: i32) -> (i32, i32) {
    %c0_i32 = arith.constant 0 : i32
    %c0_i32_0 = arith.constant 0 : i32
    %c0_i32_1 = arith.constant 0 : i32
    return %c0_i32, %c0_i32_0 : i32, i32
  }
  func.func @transform_3(%arg0: i32) -> (i32, i32) {
    %c0_i32 = arith.constant 0 : i32
    %c0_i32_0 = arith.constant 0 : i32
    %c0_i32_1 = arith.constant 0 : i32
    return %c0_i32, %c0_i32_0 : i32, i32
  }
  func.func @transform_4(%arg0: i32) -> (i32, i32) {
    %c0_i32 = arith.constant 0 : i32
    %c0_i32_0 = arith.constant 0 : i32
    %c0_i32_1 = arith.constant 0 : i32
    return %c0_i32, %c0_i32_0 : i32, i32
  }
}

</mosaic_0001>

<bundles_post_ra>
// kernel: tpu_custom_call.1
= control target key start
LH: loop header
LB: loop body
LE: loop exit
PB: predicated region body
PF: predicated region fallthrough
CT: control target
= control target key end

     0   :  { %10 = vsyncpa [#allocation3], 0  ;;  %s755_s0 = inlined_call_operand.vmem [shape: f32[64,16], index: 0, kind: input, shape index: {}]   ;;  %s756_s1 = inlined_call_operand.vmem [shape: bf16[64,32], index: 1, kind: input, shape index: {}]   ;;  %s757_s2 = inlined_call_operand.vmem [shape: f32[1,16], index: 2, kind: input, shape index: {}]   ;;  %s758_s3 = inlined_call_operand.hbm [shape: f32[1,32], index: 3, kind: output, shape index: {0}]   ;;  %s759_s4 = inlined_call_operand.hbm [shape: f32[1,32], index: 4, kind: output, shape index: {1}]  }
   0x1   :  { %11 = vsyncpa [#allocation5], 0  ;;  %s645_s15 = smov 0  }
   0x2 LB: > { %s651_s16 = sadd.s32 4294967295, %s615_s15   ;;  %p495_p0 = scmp.ge.s32.totalorder %s615_s15, 1  ;;  %s615_s15 = sphi %s645_s15, %s17_s15  }
   0x3   : > { %p185_p1 = scmp.lt.s32.totalorder %s615_s15, 3 }
   0x5   : > { %p186_p2 = pnand %p495_p0, %p185_p1 }
   0x6   : > { %s219_s17 = smul.u32 (!%p186_p2), 6, %s651_s16  ;;  %p498_p4 = scmp.ne.s32.totalorder (!%p186_p2), %s651_s16, 0 }
   0x7   : > { %189 = sbr.rel (%p186_p2) target bundleno = 285 (0x11d), region = 32 }
   0x8   : > { %p224_p3 = scmp.lt.s32.totalorder (!%p186_p2), %s219_s17, 7 }
   0xe   : > { %s761_s17 = smov (!%p224_p3, %s219_s17), 7  ;;  %250 = sbr.rel (%p498_p4) target bundleno = 21 (0x15), region = 36 }
   0xf   : > { %s496_s18 = sshll.u32 %s761_s17, 3  ;;  %s497_s19 = sshll.u32 %s761_s17, 2  ;;  %vm251_vm0 = vcmask (!%p498_p4), 253952   ;;  %v617_v0 = vmov (!%p498_p4), 0.0  }
  0x10   : > { %s227_s22 = scalar_lea.vmem %s755_s0, %s496_s18  ;;  %s662_s25 = scalar_lea.vmem %s756_s1, %s497_s19  ;;  %252 = vst.msk [vmem:[#allocation2] sm:$0x1] (!%p498_p4), %vm251_vm0, %v617_v0  ;;  %253 = vst.msk [vmem:[#allocation4] sm:$0x1] (!%p498_p4), %vm251_vm0, %v617_v0 }
  0x15 PF: > { %v305_v1 = vld [vmem:[%s227_s22] sm:$0xff]  ;;  %vm324_vm1 = vcmask 130048   ;;  %v307_v3 = vld [vmem:[%s227_s22 + $0x10] sm:$0xff]  ;;  %v306_v6 = vld [vmem:[%s227_s22 + $0x8] sm:$0xff]  ;;  %v254_v20 = vlaneseq  ;;  %s261_s28 = smul.u32 48, %s651_s16  ;;  %vm356_vm5 = vcmask 261120  }
  0x16   : > { %v499_v2 = vld [vmem:[%s757_s2] ss:$0 sm:$0xff]  ;;  %v308_v7 = vld [vmem:[%s227_s22 + $0x18] sm:$0xff]  ;;  %v310_v11 = vld [vmem:[%s227_s22 + $0x28] sm:$0xff]  ;;  %vm375_vm9 = vcmask 253952   ;;  %p500_p5 = scmp.ne.s32.totalorder %s651_s16, 1 }
  0x17   : > { %v318_v4 = vmul.f32 %v499_v2, %v305_v1  ;;  %v320_v5 = vmul.f32 %v499_v2, %v307_v3  ;;  %v319_v8 = vmul.f32 %v499_v2, %v306_v6  ;;  %v321_v9 = vmul.f32 %v499_v2, %v308_v7  ;;  %v309_v10 = vld [vmem:[%s227_s22 + $0x20] sm:$0xff]  ;;  %v520_v29 = vld [vmem:[%s662_s25 + $0x8] sm:$0xff]   ;;  %v521_v44 = vld [vmem:[%s662_s25 + $0x10] sm:$0xff]  }
  0x18   : > { %v322_v16 = vmul.f32 %v499_v2, %v309_v10  ;;  %v323_v17 = vmul.f32 %v499_v2, %v310_v11  ;;  %v255_v21 = vshrl.u32 %v254_v20, 7  ;;  %v262_v22 = vstv %s261_s28  ;;  %v509_v24 = vld [vmem:[%s662_s25] sm:$0xff]  }
  0x19   : > { %v325_v12 = vsel %vm324_vm1, %v318_v4, 0.0  ;;  %v331_v13 = vsel %vm324_vm1, %v320_v5, 0.0  ;;  %v328_v14 = vsel %vm324_vm1, %v319_v8, 0.0  ;;  %v334_v15 = vsel %vm324_vm1, %v321_v9, 0.0  ;;  %v377_v1 = vld [vmem:[#allocation4] sm:$0x1] }
  0x1a   : > { %326 = vadd.xlane.f32.xlu0 %v325_v12  ;;  %332 = vadd.xlane.f32.xlu1 %v331_v13  ;;  %v337_v18 = vsel %vm324_vm1, %v322_v16, 0.0  ;;  %v340_v19 = vsel %vm324_vm1, %v323_v17, 0.0  ;;  %v263_v23 = vadd.s32 %v262_v22, %v255_v21  ;;  %v257_v25 = vadd.s32 16, %v255_v21 }
  0x1b   : > { %v256_v26 = vadd.s32 8, %v255_v21  ;;  %v510_v27 = vunpack.c.l.bf16 %v509_v24  ;;  %v514_v31 = vunpack.c.l.bf16 %v520_v29  ;;  %v511_v32 = vunpack.c.h.bf16 %v509_v24 }
  0x1c   : > { %vm269_vm2 = vcmp.lt.s32.totalorder %v263_v23, 64  ;;  %v265_v28 = vadd.s32 %v262_v22, %v257_v25  ;;  %v258_v33 = vadd.s32 24, %v255_v21  ;;  %v259_v38 = vadd.s32 32, %v255_v21 }
  0x1d   : > { %v264_v30 = vadd.s32 %v262_v22, %v256_v26  ;;  %v299_v34 = vsel %vm269_vm2, %v510_v27, 0.0  ;;  %v515_v41 = vunpack.c.h.bf16 %v520_v29  ;;  %v260_v45 = vadd.s32 40, %v255_v21 }
  0x1e   : > { %329 = vadd.xlane.f32.xlu0 %v328_v14  ;;  %335 = vadd.xlane.f32.xlu1 %v334_v15  ;;  %vm271_vm3 = vcmp.lt.s32.totalorder %v265_v28, 64  ;;  %v378_v35 = vsel %vm356_vm5, %v299_v34, 0.0  ;;  %v266_v37 = vadd.s32 %v262_v22, %v258_v33  ;;  %v267_v43 = vadd.s32 %v262_v22, %v259_v38  ;;  %v349_v38 = vld [vmem:[#allocation2] sm:$0x1] }
  0x1f   : > { %vm270_vm4 = vcmp.lt.s32.totalorder %v264_v30, 64  ;;  %v301_v36 = vsel %vm271_vm3, %v514_v31, 0.0  ;;  %v518_v47 = vunpack.c.l.bf16 %v521_v44  ;;  %v268_v48 = vadd.s32 %v262_v22, %v260_v45 }
  0x20   : > { %v381_v39 = vsel %vm356_vm5, %v301_v36, 0.0  ;;  %v300_v40 = vsel %vm270_vm4, %v511_v32, 0.0  ;;  %vm272_vm6 = vcmp.lt.s32.totalorder %v266_v37, 64  ;;  %vm273_vm7 = vcmp.lt.s32.totalorder %v267_v43, 64 }
  0x21   : > { %v379_v42 = vsel %vm356_vm5, %v300_v40, 0.0  ;;  %v302_v49 = vsel %vm272_vm6, %v515_v41, 0.0  ;;  %v519_v51 = vunpack.c.h.bf16 %v521_v44  ;;  %vm274_vm8 = vcmp.lt.s32.totalorder %v268_v48, 64 }
  0x22   : > { %338 = vadd.xlane.f32.xlu0 %v337_v18  ;;  %341 = vadd.xlane.f32.xlu1 %v340_v19  ;;  %v380_v46 = vadd.f32 %v379_v42, %v378_v35  ;;  %v383_v52 = vsel %vm356_vm5, %v302_v49, 0.0  ;;  %v303_v54 = vsel %vm273_vm7, %v518_v47, 0.0 }
  0x23   : > { %v385_v55 = vsel %vm356_vm5, %v303_v54, 0.0  ;;  %v304_v57 = vsel %vm274_vm8, %v519_v51, 0.0 }
  0x24   : > { %v382_v50 = vadd.f32 %v381_v39, %v380_v46  ;;  %v387_v58 = vsel %vm356_vm5, %v304_v57, 0.0 }
  0x26   : > { %v384_v53 = vadd.f32 %v383_v52, %v382_v50 }
  0x28   : > { %v386_v56 = vadd.f32 %v385_v55, %v384_v53 }
  0x2a   : > { %v388_v59 = vadd.f32 %v387_v58, %v386_v56 }
  0x2c   : > { %v389_v60 = vrot.slane %v388_v59, 4 }
  0x2e   : > { %v390_v61 = vadd.f32 %v389_v60, %v388_v59 }
  0x30   : > { %v391_v62 = vrot.slane %v390_v61, 2 }
  0x32   : > { %v392_v63 = vadd.f32 %v391_v62, %v390_v61 }
  0x34   : > { %v393_v0 = vrot.slane %v392_v63, 1 }
  0x36   : > { %v394_v2 = vadd.f32 %v393_v0, %v392_v63 }
  0x38   : > { %v395_v3 = vadd.f32 %v394_v2, %v377_v1 }
  0x3a   : > { %396 = vst.msk [vmem:[#allocation4] sm:$0x1] %vm375_vm9, %v395_v3 }
  0x41   : > { %v409_v45 = vld [vmem:[#allocation4] sm:$0x1] (!%p500_p5) }
  0xa7   : > { %v327_v4 = vpop.xlane.xlu0 %326  ;;  %v333_v5 = vpop.xlane.xlu1 %332 }
  0xa8   : > { %v343_v6 = vsel %vm269_vm2, %v327_v4, 0.0  ;;  %v345_v7 = vsel %vm271_vm3, %v333_v5, 0.0 }
  0xa9   : > { %v350_v8 = vmul.f32 %v343_v6, %v299_v34  ;;  %v352_v13 = vmul.f32 %v345_v7, %v301_v36 }
  0xab   : > { %v330_v9 = vpop.xlane.xlu0 %329  ;;  %v336_v10 = vpop.xlane.xlu1 %335  ;;  %v357_v16 = vsel %vm356_vm5, %v350_v8, 0.0  ;;  %v360_v23 = vsel %vm356_vm5, %v352_v13, 0.0 }
  0xac   : > { %v344_v11 = vsel %vm270_vm4, %v330_v9, 0.0  ;;  %v346_v12 = vsel %vm272_vm6, %v336_v10, 0.0 }
  0xad   : > { %v351_v14 = vmul.f32 %v344_v11, %v300_v40  ;;  %v353_v15 = vmul.f32 %v346_v12, %v302_v49 }
  0xaf   : > { %v358_v17 = vsel %vm356_vm5, %v351_v14, 0.0  ;;  %v339_v18 = vpop.xlane.xlu0 %338  ;;  %v342_v19 = vpop.xlane.xlu1 %341  ;;  %v362_v24 = vsel %vm356_vm5, %v353_v15, 0.0 }
  0xb0   : > { %v359_v20 = vadd.f32 %v358_v17, %v357_v16  ;;  %v347_v21 = vsel %vm273_vm7, %v339_v18, 0.0  ;;  %v348_v22 = vsel %vm274_vm8, %v342_v19, 0.0 }
  0xb1   : > { %v354_v25 = vmul.f32 %v347_v21, %v303_v54  ;;  %v355_v26 = vmul.f32 %v348_v22, %v304_v57 }
  0xb2   : > { %v361_v27 = vadd.f32 %v360_v23, %v359_v20 }
  0xb3   : > { %v364_v28 = vsel %vm356_vm5, %v354_v25, 0.0  ;;  %v366_v30 = vsel %vm356_vm5, %v355_v26, 0.0 }
  0xb4   : > { %v363_v29 = vadd.f32 %v362_v24, %v361_v27 }
  0xb6   : > { %v365_v31 = vadd.f32 %v364_v28, %v363_v29 }
  0xb8   : > { %v367_v32 = vadd.f32 %v366_v30, %v365_v31 }
  0xba   : > { %v368_v33 = vrot.slane %v367_v32, 4 }
  0xbc   : > { %v369_v34 = vadd.f32 %v368_v33, %v367_v32 }
  0xbe   : > { %v370_v35 = vrot.slane %v369_v34, 2 }
  0xc0   : > { %v371_v36 = vadd.f32 %v370_v35, %v369_v34 }
  0xc2   : > { %v372_v37 = vrot.slane %v371_v36, 1  ;;  %400 = sbr.rel (%p500_p5) target bundleno = 237 (0xed), region = 40 }
  0xc4   : > { %v373_v39 = vadd.f32 %v372_v37, %v371_v36 }
  0xc6   : > { %v374_v40 = vadd.f32 %v373_v39, %v349_v38 }
  0xc8   : > { %376 = vst.msk [vmem:[#allocation2] sm:$0x1] %vm375_vm9, %v374_v40 }
  0xcf   : > { %v401_v41 = vld [vmem:[#allocation2] sm:$0x1] }
  0xd0   : > { %v501_v42 = vmul.f32 -1.442695, %v401_v41 }
  0xd2   : > { %545 = vpow2.f32 %v501_v42 }
  0xdc   : > { %v546_v43 = vpop.eup %545 }
  0xdd   : > { %v405_v44 = vadd.f32 1.0, %v546_v43 }
  0xdf   : > { %547 = vrcp.f32 %v405_v44 }
  0xe9   : > { %v548_v46 = vpop.eup %547 }
  0xea   : > { %408 = vst.msk [vmem:[#allocation2] sm:$0x1] %vm375_vm9, %v548_v46  ;;  %v410_v47 = vmul.f32 %v548_v46, %v409_v45 }
  0xec   : > { %411 = vst.msk [vmem:[#allocation4] sm:$0x1] %vm375_vm9, %v410_v47 }
  0xed PF: > { %p530_p6 = scmp.eq.s32.totalorder %s651_s16, 1  ;;  %s618_s29 = smov [#allocation2]  }
  0xee   : > { %s419_s30 = sshll.u32 %s618_s29, 4  ;;  %s619_s5 = smov [#allocation4]   ;;  %s420_s30 = int_to_ptr.vmem [resolvable:$true] %s419_s30 }
  0xef   : > { %s430_s6 = sshll.u32 %s619_s5, 4  ;;  %s549_s7 = scalar_lea.vmem %s420_s30, 16  ;;  %s431_s6 = int_to_ptr.vmem [resolvable:$true] %s430_s6 }
  0xf0   : > { %p550_p7 = scmp.ne.s32.totalorder %s420_s30, %s549_s7  ;;  %s555_s8 = scalar_lea.vmem %s420_s30, 32 }
  0xf1   : > { %p556_p10 = scmp.lt.s32.totalorder %s420_s30, %s420_s30  ;;  %p557_p11 = scmp.lt.s32.totalorder %s555_s8, %s549_s7 }
  0xf2   : > { %p551_p8 = pnand %p550_p7, %p530_p6 }
  0xf3   : > { %p558_p12 = por %p557_p11, %p556_p10 }
  0xf4   : > { %p552_p9 = pneg %p551_p8 }
  0xf6   : > { %p559_p13 = pnand %p558_p12, %p552_p9 }
  0xf8   : > { %562 = shalt.err (!%p559_p13)
}
  0xf9   : > { %s563_s11 = scalar_lea.hbm %s758_s3, 16 }
  0xfa   : > { %p564_p0 = scmp.ne.s32.totalorder %s758_s3, %s563_s11  ;;  %p569_p3 = scmp.lt.u32.totalorder %s563_s11, %s758_s3 }
  0xfc   : > { %p565_p1 = pnand %p564_p0, %p530_p6 }
  0xfe   : > { %p566_p2 = pneg %p565_p1 }
 0x100   : > { %p571_p4 = pnand %p569_p3, %p566_p2 }
 0x102   : > { %574 = shalt.err (!%p571_p4)
}
 0x103   : > { %523 = dma.vmem_to_hbm [thread:$0]  (%p530_p6), %s420_s30, 16, %s758_s3, [#allocation3]  }
 0x104   : > { %s575_s20 = scalar_lea.vmem %s431_s6, 16  ;;  %s581_s21 = scalar_lea.vmem %s431_s6, 32 }
 0x105   : > { %p576_p5 = scmp.ne.s32.totalorder %s431_s6, %s575_s20  ;;  %p582_p9 = scmp.lt.s32.totalorder %s431_s6, %s431_s6 }
 0x106   : > { %p583_p10 = scmp.lt.s32.totalorder %s581_s21, %s575_s20 }
 0x107   : > { %p577_p7 = pnand %p576_p5, %p530_p6 }
 0x108   : > { %p584_p11 = por %p583_p10, %p582_p9 }
 0x109   : > { %p578_p8 = pneg %p577_p7 }
 0x10b   : > { %p585_p12 = pnand %p584_p11, %p578_p8 }
 0x10d   : > { %588 = shalt.err (!%p585_p12)
}
 0x10e   : > { %s589_s24 = scalar_lea.hbm %s759_s4, 16 }
 0x10f   : > { %p590_p13 = scmp.ne.s32.totalorder %s759_s4, %s589_s24  ;;  %p595_p2 = scmp.lt.u32.totalorder %s589_s24, %s759_s4 }
 0x111   : > { %p591_p0 = pnand %p590_p13, %p530_p6 }
 0x113   : > { %p592_p1 = pneg %p591_p0 }
 0x115   : > { %p597_p3 = pnand %p595_p2, %p592_p1 }
 0x117   : > { %600 = shalt.err (!%p597_p3)
}
 0x118   : > { %525 = dma.vmem_to_hbm [thread:$0]  (%p530_p6), %s431_s6, 16, %s759_s4, [#allocation5]  }
 0x119   : > { %606 = dma.done.wait (%p530_p6), [#allocation3], 16  }
 0x11a   : > { %608 = vsyncadd (%p530_p6), [#allocation3], 4294967280 }
 0x11b   : > { %610 = dma.done.wait (%p530_p6), [#allocation5], 16  }
 0x11c   : > { %612 = vsyncadd (%p530_p6), [#allocation5], 4294967280 }
 0x11d PF: > { %s17_s15 = sadd.s32 1, %s615_s15  }
 0x11e   : > { %p14_p4 = scmp.ge.s32.totalorder %s17_s15, 4  }
 0x120   :  { %16 = sbr.rel (!%p14_p4) target bundleno = 2 (0x2), region = 78 }
 0x127   :  { %447 = vsyncpa [#allocation3], 1 }
 0x128   :  { %449 = vsyncpa [#allocation3 + $0x1], 1 }
 0x129   :  { %450 = vsyncpa [#allocation5], 1 }

</bundles_post_ra>
